<compile_context>
chip_gen: v6e
topology: v6e:2x2x1
jax: 0.10.0
libtpu: 0.0.40
codegen_flags: <defaults>
</compile_context>

<pallas_src>
import jax
import jax.numpy as jnp
from jax.experimental import pallas as pl
from jax.experimental.pallas import tpu as pltpu

LN_EPS = 1e-5  # PyTorch nn.LayerNorm default


def _layernorm(x, gamma, beta):
    # LayerNorm over the last axis, biased variance (matches PyTorch).
    mean = jnp.mean(x, axis=-1, keepdims=True)
    centered = x - mean
    var = jnp.mean(centered * centered, axis=-1, keepdims=True)
    inv = jax.lax.rsqrt(var + LN_EPS)
    return centered * inv * gamma + beta


def critic_kernel(
    state_ref,                 # (TB, in_size)  f32
    action_ref,                # (TB, act_dim)  f32
    w1_ref, wa_ref, w2_ref,    # weights [in, out], f32 or bf16 (MXU operands)
    p1_ref,                    # (3, fc1)  rows: b1, ln1_gamma, ln1_beta   (f32)
    p2_ref,                    # (5, fc2)  rows: ba, b2, ln2_gamma, ln2_beta, wq_row (f32)
    bq_ref,                    # (1,)  q bias scalar in SMEM
    out_ref,                   # (TB, 1)
):
    mxu_dtype = w1_ref.dtype

    b1, g1, be1 = p1_ref[0:1, :], p1_ref[1:2, :], p1_ref[2:3, :]
    ba, b2 = p2_ref[0:1, :], p2_ref[1:2, :]
    g2, be2 = p2_ref[2:3, :], p2_ref[3:4, :]
    wq_row = p2_ref[4:5, :]

    s = state_ref[...].astype(mxu_dtype)
    a = action_ref[...].astype(mxu_dtype)

    # state branch: fc1 -> ln1 -> relu -> fc2 -> ln2  (f32 accumulation)
    sv = jnp.dot(s, w1_ref[...], preferred_element_type=jnp.float32) + b1
    sv = _layernorm(sv, g1, be1)
    sv = jnp.maximum(sv, 0.0)
    sv = jnp.dot(sv.astype(mxu_dtype), w2_ref[...],
                 preferred_element_type=jnp.float32) + b2
    sv = _layernorm(sv, g2, be2)

    # action branch, combine, relu
    av = jnp.maximum(
        jnp.dot(a, wa_ref[...], preferred_element_type=jnp.float32) + ba, 0.0)
    sa = jnp.maximum(sv + av, 0.0)

    # Q projection (N=1): VPU multiply + lane reduction instead of an MXU pass.
    q = jnp.sum(sa * wq_row, axis=-1, keepdims=True) + bq_ref[0]
    out_ref[...] = q.astype(out_ref.dtype)


def _round_up(n, m):
    return ((n + m - 1) // m) * m


def critic_forward(state, action, fp, *, tb=1024):
    """Critic forward: one pallas_call, batch-tiled grid, params resident in VMEM.

    `fp` is the packed parameter dict from `pack_params`.
    """
    B = state.shape[0]
    state = state.astype(jnp.float32)
    action = action.astype(jnp.float32)
    in_size = state.shape[-1]
    act_dim = action.shape[-1]

    # Big batch tile (kernel is per-step-overhead bound), multiple of 8, but
    # keep >= 2 grid steps when the batch allows so both v7x TCs get work.
    B8 = _round_up(B, 8)
    TB = min(_round_up(tb, 8), B8)
    if B8 // TB < 2 and B8 >= 16:
        TB = _round_up(pl.cdiv(B8, 2), 8)
    B_pad = _round_up(B, TB)
    if B_pad != B:
        pad = B_pad - B
        state = jnp.pad(state, ((0, pad), (0, 0)))
        action = jnp.pad(action, ((0, pad), (0, 0)))

    w1, wa, w2 = fp["w1"], fp["wa"], fp["w2"]
    p1, p2, bq = fp["p1"], fp["p2"], fp["bq"]

    def resident(shape):
        # Full-array block, same block index every grid step -> DMA'd once and
        # kept resident in VMEM across the whole grid.
        return pl.BlockSpec(shape, lambda i: (0, 0))

    out = pl.pallas_call(
        critic_kernel,
        out_shape=jax.ShapeDtypeStruct((B_pad, 1), jnp.float32),
        grid=(B_pad // TB,),
        in_specs=[
            pl.BlockSpec((TB, in_size), lambda i: (i, 0)),
            pl.BlockSpec((TB, act_dim), lambda i: (i, 0)),
            resident(w1.shape),
            resident(wa.shape),
            resident(w2.shape),
            resident(p1.shape),
            resident(p2.shape),
            pl.BlockSpec(memory_space=pltpu.MemorySpace.SMEM),
        ],
        out_specs=pl.BlockSpec((TB, 1), lambda i: (i, 0)),
        compiler_params=pltpu.CompilerParams(
            dimension_semantics=("parallel",),     # shard batch tiles across TCs
            vmem_limit_bytes=32 * 1024 * 1024,     # headroom (v5e default is 16 MiB)
        ),
    )(state, action, w1, wa, w2, p1, p2, bq)
    return out[:B]


def init_params(key, in_size, fc1, fc2, n_actions, n_agents):
    """Deterministic synthetic parameters (PyTorch-style uniform ranges)."""
    ks = jax.random.split(key, 8)
    f1 = 1.0 / jnp.sqrt(fc1)
    f2 = 1.0 / jnp.sqrt(fc2)
    f3 = 0.003
    act_dim = n_actions * n_agents
    fa = 1.0 / jnp.sqrt(act_dim)

    def u(k, shape, bound):
        return jax.random.uniform(k, shape, jnp.float32, -bound, bound)

    return {
        # Linear weights stored as [in, out] (transposed vs. PyTorch's [out, in]).
        "w1": u(ks[0], (in_size, fc1), f1),
        "b1": u(ks[1], (1, fc1), f1),
        "g1": jnp.ones((1, fc1), jnp.float32),
        "be1": jnp.zeros((1, fc1), jnp.float32),
        "w2": u(ks[2], (fc1, fc2), f2),
        "b2": u(ks[3], (1, fc2), f2),
        "g2": jnp.ones((1, fc2), jnp.float32),
        "be2": jnp.zeros((1, fc2), jnp.float32),
        "wa": u(ks[4], (act_dim, fc2), fa),
        "ba": u(ks[5], (1, fc2), fa),
        "wq": u(ks[6], (fc2, 1), f3),
        "bq": u(ks[7], (1, 1), f3),
    }


def pack_params(p, compute_dtype=jnp.float32):
    """Pack raw params into the kernel layout (done once at init time):
      - matmul weights cast to `compute_dtype` (bf16 recommended on v6e/v7x),
      - the small per-feature vectors stacked into two tiles (fewer DMA
        descriptors / VMEM tiles),
      - scalar q bias routed to SMEM.
    LayerNorm/bias/Q-row params stay f32 (LN math is f32 in-kernel)."""
    return {
        "w1": p["w1"].astype(compute_dtype),
        "wa": p["wa"].astype(compute_dtype),
        "w2": p["w2"].astype(compute_dtype),
        "p1": jnp.concatenate([p["b1"], p["g1"], p["be1"]],
                              axis=0).astype(jnp.float32),              # (3, fc1)
        "p2": jnp.concatenate([p["ba"], p["b2"], p["g2"], p["be2"], p["wq"].T],
                              axis=0).astype(jnp.float32),              # (5, fc2)
        "bq": p["bq"].reshape(1).astype(jnp.float32),                   # (1,) SMEM
    }


def critic_reference(state, action, p):
    """Pure-JAX reference implementing the original module math."""
    sv = state @ p["w1"] + p["b1"]
    sv = _layernorm(sv, p["g1"], p["be1"])
    sv = jnp.maximum(sv, 0.0)
    sv = sv @ p["w2"] + p["b2"]
    sv = _layernorm(sv, p["g2"], p["be2"])
    av = jnp.maximum(action @ p["wa"] + p["ba"], 0.0)
    sa = jnp.maximum(sv + av, 0.0)
    return sa @ p["wq"] + p["bq"]


if __name__ == "__main__":
    # Small shapes consistent with the module's forward.
    B = 20
    in_size = 32
    fc1_dim = 64
    fc2_dim = 64
    n_actions = 4
    n_agents = 2

    key = jax.random.PRNGKey(0)
    k_state, k_action, k_params = jax.random.split(key, 3)

    state = jax.random.normal(k_state, (B, in_size), jnp.float32)
    action = jax.random.normal(k_action, (B, n_actions * n_agents), jnp.float32)
    params = init_params(k_params, in_size, fc1_dim, fc2_dim, n_actions, n_agents)
    ref = critic_reference(state, action, params)

    # 1) f32 path, tiny tile: exercises the multi-step grid + batch padding,
    #    checked at tight tolerance.
    out_f32 = critic_forward(state, action, pack_params(params, jnp.float32), tb=8)
    out_f32 = jax.block_until_ready(out_f32)
    assert out_f32.shape == (B, 1)
    assert jnp.allclose(out_f32, ref, atol=1e-4, rtol=1e-4), (out_f32, ref)

    # 2) bf16 MXU operands (recommended on v6e/v7x), default big tile, larger
    #    batch: exercises the ">= 2 grid steps" clamp.  LN/ReLU/Q stay f32, so
    #    only the matmul operands are bf16 -> loose tolerance vs f32 reference.
    B2 = 256
    k_s2, k_a2 = jax.random.split(jax.random.PRNGKey(1))
    state2 = jax.random.normal(k_s2, (B2, in_size), jnp.float32)
    action2 = jax.random.normal(k_a2, (B2, n_actions * n_agents), jnp.float32)
    ref2 = critic_reference(state2, action2, params)
    out_bf16 = critic_forward(state2, action2, pack_params(params, jnp.bfloat16))
    out_bf16 = jax.block_until_ready(out_bf16)
    assert out_bf16.shape == (B2, 1)
    assert jnp.allclose(out_bf16, ref2, atol=2e-2, rtol=2e-2), (out_bf16, ref2)

    print("KERNEL_OK")
</pallas_src>

<mosaic_0001>
module attributes {stable_mosaic.version = 11 : i64} {
  func.func @critic_kernel(%arg0: i32, %arg1: memref<8x32xf32, #tpu.memory_space<vmem>>, %arg2: memref<8x8xf32, #tpu.memory_space<vmem>>, %arg3: memref<32x64xf32, #tpu.memory_space<vmem>>, %arg4: memref<8x64xf32, #tpu.memory_space<vmem>>, %arg5: memref<64x64xf32, #tpu.memory_space<vmem>>, %arg6: memref<3x64xf32, #tpu.memory_space<vmem>>, %arg7: memref<5x64xf32, #tpu.memory_space<vmem>>, %arg8: memref<1xf32, #tpu.memory_space<smem>>, %arg9: memref<8x1xf32, #tpu.memory_space<vmem>>) attributes {dimension_semantics = [#tpu.dimension_semantics<parallel>], iteration_bounds = array<i64: 3>, scalar_prefetch = 0 : i64, scratch_operands = 0 : i64, tpu.core_type = #tpu.core_type<tc>, window_params = [{transform_indices = @transform_0, window_bounds = array<i64: 8, 32>}, {transform_indices = @transform_1, window_bounds = array<i64: 8, 8>}, {pipeline_mode = #tpu.pipeline_mode<synchronous>, transform_indices = @transform_2, window_bounds = array<i64: 32, 64>}, {pipeline_mode = #tpu.pipeline_mode<synchronous>, transform_indices = @transform_3, window_bounds = array<i64: 8, 64>}, {pipeline_mode = #tpu.pipeline_mode<synchronous>, transform_indices = @transform_4, window_bounds = array<i64: 64, 64>}, {pipeline_mode = #tpu.pipeline_mode<synchronous>, transform_indices = @transform_5, window_bounds = array<i64: 3, 64>}, {pipeline_mode = #tpu.pipeline_mode<synchronous>, transform_indices = @transform_6, window_bounds = array<i64: 5, 64>}, {transform_indices = @transform_7, window_bounds = array<i64: 1>}, {transform_indices = @transform_8, window_bounds = array<i64: 8, 1>}]} {
    %c0 = arith.constant 0 : index
    %c0_0 = arith.constant 0 : index
    %0 = vector.load %arg6[%c0, %c0_0] : memref<3x64xf32, #tpu.memory_space<vmem>>, vector<1x64xf32>
    %c1 = arith.constant 1 : index
    %c0_1 = arith.constant 0 : index
    %1 = vector.load %arg6[%c1, %c0_1] : memref<3x64xf32, #tpu.memory_space<vmem>>, vector<1x64xf32>
    %c2 = arith.constant 2 : index
    %c0_2 = arith.constant 0 : index
    %2 = vector.load %arg6[%c2, %c0_2] : memref<3x64xf32, #tpu.memory_space<vmem>>, vector<1x64xf32>
    %c0_3 = arith.constant 0 : index
    %c0_4 = arith.constant 0 : index
    %3 = vector.load %arg7[%c0_3, %c0_4] : memref<5x64xf32, #tpu.memory_space<vmem>>, vector<1x64xf32>
    %c1_5 = arith.constant 1 : index
    %c0_6 = arith.constant 0 : index
    %4 = vector.load %arg7[%c1_5, %c0_6] : memref<5x64xf32, #tpu.memory_space<vmem>>, vector<1x64xf32>
    %c2_7 = arith.constant 2 : index
    %c0_8 = arith.constant 0 : index
    %5 = vector.load %arg7[%c2_7, %c0_8] : memref<5x64xf32, #tpu.memory_space<vmem>>, vector<1x64xf32>
    %c3 = arith.constant 3 : index
    %c0_9 = arith.constant 0 : index
    %6 = vector.load %arg7[%c3, %c0_9] : memref<5x64xf32, #tpu.memory_space<vmem>>, vector<1x64xf32>
    %c4 = arith.constant 4 : index
    %c0_10 = arith.constant 0 : index
    %7 = vector.load %arg7[%c4, %c0_10] : memref<5x64xf32, #tpu.memory_space<vmem>>, vector<1x64xf32>
    %c0_11 = arith.constant 0 : index
    %c0_12 = arith.constant 0 : index
    %8 = vector.load %arg1[%c0_11, %c0_12] : memref<8x32xf32, #tpu.memory_space<vmem>>, vector<8x32xf32>
    %c0_13 = arith.constant 0 : index
    %c0_14 = arith.constant 0 : index
    %9 = vector.load %arg2[%c0_13, %c0_14] : memref<8x8xf32, #tpu.memory_space<vmem>>, vector<8x8xf32>
    %c0_15 = arith.constant 0 : index
    %c0_16 = arith.constant 0 : index
    %10 = vector.load %arg3[%c0_15, %c0_16] : memref<32x64xf32, #tpu.memory_space<vmem>>, vector<32x64xf32>
    %cst = arith.constant dense<0.000000e+00> : vector<8x64xf32>
    %11 = tpu.matmul %8, %10, %cst {dimension_numbers = #tpu.dot_dimension_numbers<[1], [0], [0], [1], [0, 0, 1, 1], [], []>} : vector<8x32xf32>, vector<32x64xf32>, vector<8x64xf32> -> vector<8x64xf32>
    %12 = vector.broadcast %0 : vector<1x64xf32> to vector<8x64xf32>
    %13 = arith.addf %11, %12 : vector<8x64xf32>
    %cst_17 = arith.constant dense<0.000000e+00> : vector<8xf32>
    %14 = vector.multi_reduction <add>, %13, %cst_17 [1] : vector<8x64xf32> to vector<8xf32>
    %15 = vector.shape_cast %14 : vector<8xf32> to vector<8x1xf32>
    %cst_18 = arith.constant 6.400000e+01 : f32
    %16 = vector.broadcast %cst_18 : f32 to vector<8x1xf32>
    %17 = arith.divf %15, %16 : vector<8x1xf32>
    %18 = vector.broadcast %17 : vector<8x1xf32> to vector<8x64xf32>
    %19 = arith.subf %13, %18 : vector<8x64xf32>
    %20 = arith.mulf %19, %19 : vector<8x64xf32>
    %cst_19 = arith.constant dense<0.000000e+00> : vector<8xf32>
    %21 = vector.multi_reduction <add>, %20, %cst_19 [1] : vector<8x64xf32> to vector<8xf32>
    %22 = vector.shape_cast %21 : vector<8xf32> to vector<8x1xf32>
    %cst_20 = arith.constant 6.400000e+01 : f32
    %23 = vector.broadcast %cst_20 : f32 to vector<8x1xf32>
    %24 = arith.divf %22, %23 : vector<8x1xf32>
    %cst_21 = arith.constant 9.99999974E-6 : f32
    %25 = vector.broadcast %cst_21 : f32 to vector<8x1xf32>
    %26 = arith.addf %24, %25 : vector<8x1xf32>
    %27 = math.rsqrt %26 : vector<8x1xf32>
    %28 = vector.broadcast %27 : vector<8x1xf32> to vector<8x64xf32>
    %29 = arith.mulf %19, %28 : vector<8x64xf32>
    %30 = vector.broadcast %1 : vector<1x64xf32> to vector<8x64xf32>
    %31 = arith.mulf %29, %30 : vector<8x64xf32>
    %32 = vector.broadcast %2 : vector<1x64xf32> to vector<8x64xf32>
    %33 = arith.addf %31, %32 : vector<8x64xf32>
    %cst_22 = arith.constant 0.000000e+00 : f32
    %34 = vector.broadcast %cst_22 : f32 to vector<8x64xf32>
    %35 = arith.maximumf %33, %34 : vector<8x64xf32>
    %c0_23 = arith.constant 0 : index
    %c0_24 = arith.constant 0 : index
    %36 = vector.load %arg5[%c0_23, %c0_24] : memref<64x64xf32, #tpu.memory_space<vmem>>, vector<64x64xf32>
    %cst_25 = arith.constant dense<0.000000e+00> : vector<8x64xf32>
    %37 = tpu.matmul %35, %36, %cst_25 {dimension_numbers = #tpu.dot_dimension_numbers<[1], [0], [0], [1], [0, 0, 1, 1], [], []>} : vector<8x64xf32>, vector<64x64xf32>, vector<8x64xf32> -> vector<8x64xf32>
    %38 = vector.broadcast %4 : vector<1x64xf32> to vector<8x64xf32>
    %39 = arith.addf %37, %38 : vector<8x64xf32>
    %cst_26 = arith.constant dense<0.000000e+00> : vector<8xf32>
    %40 = vector.multi_reduction <add>, %39, %cst_26 [1] : vector<8x64xf32> to vector<8xf32>
    %41 = vector.shape_cast %40 : vector<8xf32> to vector<8x1xf32>
    %cst_27 = arith.constant 6.400000e+01 : f32
    %42 = vector.broadcast %cst_27 : f32 to vector<8x1xf32>
    %43 = arith.divf %41, %42 : vector<8x1xf32>
    %44 = vector.broadcast %43 : vector<8x1xf32> to vector<8x64xf32>
    %45 = arith.subf %39, %44 : vector<8x64xf32>
    %46 = arith.mulf %45, %45 : vector<8x64xf32>
    %cst_28 = arith.constant dense<0.000000e+00> : vector<8xf32>
    %47 = vector.multi_reduction <add>, %46, %cst_28 [1] : vector<8x64xf32> to vector<8xf32>
    %48 = vector.shape_cast %47 : vector<8xf32> to vector<8x1xf32>
    %cst_29 = arith.constant 6.400000e+01 : f32
    %49 = vector.broadcast %cst_29 : f32 to vector<8x1xf32>
    %50 = arith.divf %48, %49 : vector<8x1xf32>
    %cst_30 = arith.constant 9.99999974E-6 : f32
    %51 = vector.broadcast %cst_30 : f32 to vector<8x1xf32>
    %52 = arith.addf %50, %51 : vector<8x1xf32>
    %53 = math.rsqrt %52 : vector<8x1xf32>
    %54 = vector.broadcast %53 : vector<8x1xf32> to vector<8x64xf32>
    %55 = arith.mulf %45, %54 : vector<8x64xf32>
    %56 = vector.broadcast %5 : vector<1x64xf32> to vector<8x64xf32>
    %57 = arith.mulf %55, %56 : vector<8x64xf32>
    %58 = vector.broadcast %6 : vector<1x64xf32> to vector<8x64xf32>
    %59 = arith.addf %57, %58 : vector<8x64xf32>
    %c0_31 = arith.constant 0 : index
    %c0_32 = arith.constant 0 : index
    %60 = vector.load %arg4[%c0_31, %c0_32] : memref<8x64xf32, #tpu.memory_space<vmem>>, vector<8x64xf32>
    %cst_33 = arith.constant dense<0.000000e+00> : vector<8x64xf32>
    %61 = tpu.matmul %9, %60, %cst_33 {dimension_numbers = #tpu.dot_dimension_numbers<[1], [0], [0], [1], [0, 0, 1, 1], [], []>} : vector<8x8xf32>, vector<8x64xf32>, vector<8x64xf32> -> vector<8x64xf32>
    %62 = vector.broadcast %3 : vector<1x64xf32> to vector<8x64xf32>
    %63 = arith.addf %61, %62 : vector<8x64xf32>
    %cst_34 = arith.constant 0.000000e+00 : f32
    %64 = vector.broadcast %cst_34 : f32 to vector<8x64xf32>
    %65 = arith.maximumf %63, %64 : vector<8x64xf32>
    %66 = arith.addf %59, %65 : vector<8x64xf32>
    %cst_35 = arith.constant 0.000000e+00 : f32
    %67 = vector.broadcast %cst_35 : f32 to vector<8x64xf32>
    %68 = arith.maximumf %66, %67 : vector<8x64xf32>
    %69 = vector.broadcast %7 : vector<1x64xf32> to vector<8x64xf32>
    %70 = arith.mulf %68, %69 : vector<8x64xf32>
    %cst_36 = arith.constant dense<0.000000e+00> : vector<8xf32>
    %71 = vector.multi_reduction <add>, %70, %cst_36 [1] : vector<8x64xf32> to vector<8xf32>
    %72 = vector.shape_cast %71 : vector<8xf32> to vector<8x1xf32>
    %c0_37 = arith.constant 0 : index
    %73 = memref.load %arg8[%c0_37] : memref<1xf32, #tpu.memory_space<smem>>
    %74 = vector.broadcast %73 : f32 to vector<8x1xf32>
    %75 = arith.addf %72, %74 : vector<8x1xf32>
    %c0_38 = arith.constant 0 : index
    %c0_39 = arith.constant 0 : index
    %76 = vector.load %arg9[%c0_38, %c0_39] : memref<8x1xf32, #tpu.memory_space<vmem>>, vector<8x1xf32>
    tpu.vector_store %arg9[%c0_38, %c0_39], %75 {strides = array<i32>} : memref<8x1xf32, #tpu.memory_space<vmem>>, vector<8x1xf32>,
    return
  }
  func.func @transform_0(%arg0: i32) -> (i32, i32) {
    %c0_i32 = arith.constant 0 : i32
    %c0_i32_0 = arith.constant 0 : i32
    return %arg0, %c0_i32 : i32, i32
  }
  func.func @transform_1(%arg0: i32) -> (i32, i32) {
    %c0_i32 = arith.constant 0 : i32
    %c0_i32_0 = arith.constant 0 : i32
    return %arg0, %c0_i32 : i32, i32
  }
  func.func @transform_2(%arg0: i32) -> (i32, i32) {
    %c0_i32 = arith.constant 0 : i32
    %c0_i32_0 = arith.constant 0 : i32
    %c0_i32_1 = arith.constant 0 : i32
    return %c0_i32, %c0_i32_0 : i32, i32
  }
  func.func @transform_3(%arg0: i32) -> (i32, i32) {
    %c0_i32 = arith.constant 0 : i32
    %c0_i32_0 = arith.constant 0 : i32
    %c0_i32_1 = arith.constant 0 : i32
    return %c0_i32, %c0_i32_0 : i32, i32
  }
  func.func @transform_4(%arg0: i32) -> (i32, i32) {
    %c0_i32 = arith.constant 0 : i32
    %c0_i32_0 = arith.constant 0 : i32
    %c0_i32_1 = arith.constant 0 : i32
    return %c0_i32, %c0_i32_0 : i32, i32
  }
  func.func @transform_5(%arg0: i32) -> (i32, i32) {
    %c0_i32 = arith.constant 0 : i32
    %c0_i32_0 = arith.constant 0 : i32
    %c0_i32_1 = arith.constant 0 : i32
    return %c0_i32, %c0_i32_0 : i32, i32
  }
  func.func @transform_6(%arg0: i32) -> (i32, i32) {
    %c0_i32 = arith.constant 0 : i32
    %c0_i32_0 = arith.constant 0 : i32
    %c0_i32_1 = arith.constant 0 : i32
    return %c0_i32, %c0_i32_0 : i32, i32
  }
  func.func @transform_7(%arg0: i32) -> i32 {
    %c0_i32 = arith.constant 0 : i32
    %c0_i32_0 = arith.constant 0 : i32
    return %c0_i32 : i32
  }
  func.func @transform_8(%arg0: i32) -> (i32, i32) {
    %c0_i32 = arith.constant 0 : i32
    %c0_i32_0 = arith.constant 0 : i32
    return %arg0, %c0_i32 : i32, i32
  }
}

</mosaic_0001>

<bundles_post_ra>
// kernel: tpu_custom_call.1
= control target key start
LH: loop header
LB: loop body
LE: loop exit
PB: predicated region body
PF: predicated region fallthrough
CT: control target
= control target key end

     0   :  { %s1355_s0 = inlined_call_operand.hbm [shape: f32[24,32], index: 0, kind: input, shape index: {}]   ;;  %s1356_s1 = inlined_call_operand.vmem [shape: f32[24,8], index: 1, kind: input, shape index: {}]   ;;  %s1357_s2 = inlined_call_operand.vmem [shape: f32[32,64], index: 2, kind: input, shape index: {}]   ;;  %s1358_s3 = inlined_call_operand.hbm [shape: f32[8,64], index: 3, kind: input, shape index: {}]   ;;  %s1359_s4 = inlined_call_operand.hbm [shape: f32[64,64], index: 4, kind: input, shape index: {}]   ;;  %s1360_s5 = inlined_call_operand.hbm [shape: f32[3,64], index: 5, kind: input, shape index: {}]   ;;  %s1361_s6 = inlined_call_operand.vmem [shape: f32[5,64], index: 6, kind: input, shape index: {}]   ;;  %s1362_s7 = inlined_call_operand.<no memory space> [shape: f32[1], index: 7, kind: input, shape index: {}]   ;;  %s1363_s8 = inlined_call_operand.vmem [shape: f32[24,1], index: 8, kind: output, shape index: {}]  }
   0x1   :  { %13 = sst [smem:[#allocation2]] %s1362_s7 }
   0x2   :  { %14 = vsyncpa [#allocation4], 0 }
   0x3   :  { %16 = vsyncpa [#allocation4 + $0x1], 0 }
   0x4   :  { %17 = vsyncpa [#allocation6], 0 }
   0x5   :  { %18 = vsyncpa [#allocation9], 0  ;;  %s1169_s29 = smov 0   ;;  %s1171_s30 = smov 0  }
   0x6   :  { %s1173_s9 = smov 0   ;;  %s1175_s10 = smov 0  }
   0x7 LB: > { %s1188_s7 = sadd.s32 4294967295, %s1111_s10   ;;  %p44_p0 = scmp.ne.s32.totalorder %s1103_s30, %s1099_s29  ;;  %s1111_s10 = sphi %s1175_s10, %s1380_s10   ;;  %s1107_s9 = sphi %s1173_s9, %s1379_s9   ;;  %s1103_s30 = sphi %s1171_s30, %s1378_s30   ;;  %s1099_s29 = sphi %s1169_s29, %s1377_s29  }
   0x8   : > { %p1364_p1 = scmp.eq.s32.totalorder %s1188_s7, 0  ;;  %p807_p2 = scmp.ge.s32.totalorder %s1111_s10, 1 }
   0x9   : > { %p233_p3 = scmp.lt.s32.totalorder %s1111_s10, 4  ;;  %s1113_s13 = smov [#allocation5]  }
   0xa   : > { %p1196_p4 = por %p1364_p1, %p44_p0  ;;  %s249_s14 = sshll.u32 %s1113_s13, 4  ;;  %s250_s14 = int_to_ptr.vmem [resolvable:$true] %s249_s14 }
   0xb   : > { %p1200_p5 = pnand %p807_p2, %p233_p3  ;;  %s1114_s15 = smov [#allocation7]  }
   0xc   : > { %s1367_s11 = scalar_select %p1196_p4, 1, 0 }
   0xd   : > { %s1368_s12 = scalar_select %p1200_p5, 1, 0 }
   0xe   : > { %p899_p6 = pneg %p1200_p5  ;;  %s259_s16 = sshll.u32 %s1114_s15, 4  ;;  %s260_s16 = int_to_ptr.vmem [resolvable:$true] %s259_s16 }
   0xf   : > { %s1115_s18 = smov [#allocation8]   ;;  %s974_s20 = scalar_lea.vmem %s250_s14, 128 }
  0x10   : > { %p1208_p7 = pnand %p899_p6, %p1364_p1  ;;  %s273_s19 = sshll.u32 %s1115_s18, 4  ;;  %s274_s19 = int_to_ptr.vmem [resolvable:$true] %s273_s19 }
  0x11   : > { %p975_p9 = scmp.ne.s32.totalorder %s250_s14, %s974_s20  ;;  %p982_p12 = scmp.lt.s32.totalorder %s250_s14, %s250_s14 }
  0x12   : > { %p965_p8 = pneg %p1208_p7  ;;  %p983_p13 = scmp.lt.s32.totalorder %s974_s20, %s974_s20 }
  0x14   : > { %p977_p10 = pnand %p975_p9, %p965_p8  ;;  %p984_p0 = por %p983_p13, %p982_p12 }
  0x16   : > { %p978_p11 = pneg %p977_p10 }
  0x18   : > { %p985_p2 = pnand %p984_p0, %p978_p11 }
  0x1a   : > { %988 = shalt.err (!%p985_p2)
}
  0x1b   : > { %902 = dma.hbm_to_vmem [thread:$0]  (!%p1208_p7), %s1358_s3, 128, %s250_s14, [#allocation6]  }
  0x1c   : > { %s1000_s23 = scalar_lea.vmem %s260_s16, 1024  ;;  %p1008_p9 = scmp.lt.s32.totalorder %s260_s16, %s260_s16 }
  0x1d   : > { %p1001_p3 = scmp.ne.s32.totalorder %s260_s16, %s1000_s23  ;;  %p1009_p10 = scmp.lt.s32.totalorder %s1000_s23, %s1000_s23 }
  0x1f   : > { %p1003_p6 = pnand %p1001_p3, %p965_p8  ;;  %p1010_p4 = por %p1009_p10, %p1008_p9 }
  0x21   : > { %p1004_p1 = pneg %p1003_p6 }
  0x23   : > { %p1011_p5 = pnand %p1010_p4, %p1004_p1 }
  0x25   : > { %1014 = shalt.err (!%p1011_p5)
}
  0x26   : > { %s1116_s24 = smov 128   ;;  %s1117_s25 = smov 8  }
  0x27   : > { %905 = dma.hbm_to_vmem [thread:$0]  (!%p1208_p7), %s1359_s4, 1024, %s260_s16, [#allocation6], %s1116_s24, %s1116_s24, %s1117_s25  }
  0x28   : > { %s1026_s28 = scalar_lea.vmem %s274_s19, 64  ;;  %p1034_p0 = scmp.lt.s32.totalorder %s274_s19, %s274_s19 }
  0x29   : > { %p1027_p11 = scmp.ne.s32.totalorder %s274_s19, %s1026_s28  ;;  %p1035_p2 = scmp.lt.s32.totalorder %s1026_s28, %s1026_s28 }
  0x2b   : > { %p1029_p12 = pnand %p1027_p11, %p965_p8  ;;  %p1036_p1 = por %p1035_p2, %p1034_p0 }
  0x2d   : > { %p1030_p13 = pneg %p1029_p12 }
  0x2f   : > { %p1037_p4 = pnand %p1036_p1, %p1030_p13 }
  0x31   : > { %1040 = shalt.err (!%p1037_p4)
}
  0x32   : > { %908 = dma.hbm_to_vmem [thread:$0]  (!%p1208_p7), %s1360_s5, 64, %s274_s19, [#allocation9]  }
  0x33   : > { %s1239_s14 = sadd.s32 1, %s1111_s10   ;;  %s31_s16 = sadd.s32 1, %s1107_s9 }
  0x34   : > { %s28_s15 = ssub.s32 %s1111_s10, %s1239_s14  ;;  %p38_p8 = scmp.ne.s32.totalorder %s1107_s9, %s1103_s30 }
  0x35   : > { %p29_p5 = scmp.eq.s32.totalorder %s28_s15, 0  ;;  %p39_p3 = scmp.eq.s32.totalorder %s1111_s10, 0 }
  0x36   : > { %p916_p6 = scmp.lt.s32.totalorder %s1111_s10, 3  ;;  %s290_s18 = sand.u32 1, %s1107_s9  }
  0x37   : > { %s1249_s17 = scalar_select %p29_p5, %s1107_s9, %s31_s16  }
  0x38   : > { %p40_p9 = por %p39_p3, %p38_p8  ;;  %s812_s20 = sshll.u32 %s290_s18, 3 }
  0x39   : > { %s813_s21 = sshll.u32 %s1111_s10, 7  ;;  %s294_s19 = scalar_lea.vmem [#allocation3], %s812_s20 }
  0x3a   : > { %s1256_s24 = scalar_lea.hbm %s1355_s0, %s813_s21  ;;  %s301_s25 = sshll.u32 %s294_s19, 4  ;;  %s302_s25 = int_to_ptr.vmem [resolvable:$true] %s301_s25 }
  0x3b   : > { %p1258_p7 = pnand %p916_p6, %p40_p9  ;;  %s291_s27 = scalar_lea.sflag [#allocation4], %s290_s18 }
  0x3c   : > { %s1041_s28 = scalar_lea.hbm %s1256_s24, 128  ;;  %s1046_s13 = scalar_lea.hbm %s1355_s0, 384 }
  0x3d   : > { %p1042_p10 = scmp.ne.s32.totalorder %s1256_s24, %s1041_s28  ;;  %p1043_p11 = pneg %p1258_p7 }
  0x3e   : > { %p1047_p0 = scmp.lt.s32.totalorder %s1256_s24, %s1355_s0  ;;  %p1048_p2 = scmp.lt.s32.totalorder %s1046_s13, %s1041_s28 }
  0x3f   : > { %p1044_p12 = pnand %p1043_p11, %p1042_p10 }
  0x40   : > { %p1049_p1 = por %p1048_p2, %p1047_p0 }
  0x41   : > { %p1045_p13 = pneg %p1044_p12 }
  0x43   : > { %p1050_p4 = pnand %p1049_p1, %p1045_p13 }
  0x45   : > { %1053 = shalt.err (!%p1050_p4)
}
  0x46   : > { %s1054_s20 = scalar_lea.vmem %s302_s25, 128  ;;  %s1118_s18 = smov [#allocation3]  }
  0x47   : > { %p1055_p5 = scmp.ne.s32.totalorder %s302_s25, %s1054_s20  ;;  %s1059_s21 = sshll.u32 %s1118_s18, 4  ;;  %s1060_s21 = int_to_ptr.vmem [resolvable:$false] %s1059_s21 }
  0x48   : > { %s1061_s22 = scalar_lea.vmem %s1060_s21, 256  ;;  %p1062_p6 = scmp.lt.s32.totalorder %s302_s25, %s1060_s21 }
  0x49   : > { %p1057_p8 = pnand %p1055_p5, %p1043_p11  ;;  %p1063_p9 = scmp.lt.s32.totalorder %s1061_s22, %s1054_s20 }
  0x4b   : > { %p1058_p3 = pneg %p1057_p8  ;;  %p1064_p10 = por %p1063_p9, %p1062_p6 }
  0x4d   : > { %p1065_p12 = pnand %p1064_p10, %p1058_p3 }
  0x4f   : > { %1068 = shalt.err (!%p1065_p12)
}
  0x50   : > { %912 = dma.hbm_to_vmem [thread:$0]  (!%p1258_p7), %s1256_s24, 128, %s302_s25, %s291_s27  }
  0x51   : > { %p1371_p13 = scmp.ne.s32.totalorder %s1368_s12, 0 }
  0x52   : > { %s319_s23 = sand.u32 (!%p1371_p13), 1, %s1103_s30   ;;  %p1372_p11 = scmp.ne.s32.totalorder (!%p1371_p13), %s1367_s11, 0 }
  0x53   : > { %317 = sbr.rel (%p1371_p13) target bundleno = 1261 (0x4ed), region = 52  ;;  %s815_s19 = sshll.u32 (!%p1371_p13), %s319_s23, 3 }
  0x54   : > { %s320_s28 = scalar_lea.sflag (!%p1371_p13), [#allocation4], %s319_s23  ;;  %s323_s10 = scalar_lea.vmem (!%p1371_p13), [#allocation3], %s815_s19 }
  0x58   : > { %1086 = dma.done.wait (%p1372_p11), %s320_s28, 128  }
  0x59   : > { %1088 = vsyncadd (%p1372_p11), %s320_s28, 4294967168  ;;  %p1373_p0 = scmp.eq.s32.totalorder %s1188_s7, 0 }
  0x5b   : > { %1090 = dma.done.wait (%p1373_p0), [#allocation6], 1152   ;;  %p1374_p2 = pmov %p1373_p0 }
  0x5c   : > { %p1375_p7 = pmov %p1373_p0 }
  0x5d   : > { %1092 = vsyncadd (%p1374_p2), [#allocation6], 4294966144 }
  0x5e   : > { %1094 = dma.done.wait (%p1375_p7), [#allocation9], 64   ;;  %p1376_p1 = pmov %p1373_p0 }
  0x5f   : > { %v1119_v0 = vmov 0.0   ;;  %vm1120_vm0 = vmmov 0   ;;  %v392_v1 = vld [vmem:[%s1357_s2 + $0x18] sm:$0xff]  ;;  %v391_v2 = vld [vmem:[%s1357_s2 + $0x10] sm:$0xff]  ;;  %v390_v3 = vld [vmem:[%s1357_s2 + $0x8] sm:$0xff]  ;;  %vm397_vm1 = vcmask 261120  }
  0x60   : > { %1096 = vsyncadd (%p1376_p1), [#allocation9], 4294967232  ;;  %850 = vmatprep.subr.mxu0 %v1119_v0  ;;  %858 = vmatprep.mubr.msk.f32.mxu0 %vm1120_vm0, %v1119_v0  ;;  %v389_v4 = vld [vmem:[%s1357_s2] sm:$0xff]  ;;  %v821_v6 = vld [vmem:[#allocation8] ss:$0 sm:$0xff]  ;;  %vm471_vm2 = vcmask 523264  }
  0x61   : > { %861 = vmatprep.subr.mxu1 %v1119_v0  ;;  %877 = vmatprep.mubr.msk.f32.mxu1 %vm1120_vm0, %v1119_v0  ;;  %v387_v5 = vld [vmem:[%s323_s10] sm:$0xff]  ;;  %v504_v16 = vld [vmem:[#allocation7 + $0x38] sm:$0xff]  ;;  %v501_v19 = vld [vmem:[#allocation7 + $0x20] sm:$0xff]  ;;  %p371_p4 = scmp.lt.s32.totalorder %s1188_s7, 2  ;;  %vm610_vm3 = vcmask 64512   ;;  %s695_s26 = sld [smem:[#allocation2]] }
  0x62   : > { %851 = vmatpush3.msra.mxu0 %v392_v1  ;;  %v503_v17 = vld [vmem:[#allocation7 + $0x30] sm:$0xff]  ;;  %862 = vmatpush3.msra.mxu1 %v504_v16  ;;  %v502_v18 = vld [vmem:[#allocation7 + $0x28] sm:$0xff]  ;;  %v500_v20 = vld [vmem:[#allocation7 + $0x18] sm:$0xff]  ;;  %vm698_vm4 = vcmask 7168  }
  0x63   : > { %852 = vmatprep.subr.mxu0 %v1119_v0  ;;  %863 = vmatprep.subr.mxu1 %v1119_v0  ;;  %v499_v21 = vld [vmem:[#allocation7 + $0x10] sm:$0xff]  ;;  %v498_v22 = vld [vmem:[#allocation7 + $0x8] sm:$0xff]  ;;  %v497_v23 = vld [vmem:[#allocation7] sm:$0xff]  ;;  %s1382_s7 = smov (!%p371_p4, %s1188_s7), 2 }
  0x64   : > { %853 = vmatpush3.msra.mxu0 %v391_v2  ;;  %864 = vmatpush3.msra.mxu1 %v503_v17  ;;  %v823_v28 = vld [vmem:[#allocation8 + $0x1] ss:$0 sm:$0xff]  ;;  %v824_v30 = vld [vmem:[#allocation8 + $0x2] ss:$0 sm:$0xff]  ;;  %v605_v34 = vld [vmem:[#allocation5] sm:$0xff]  ;;  %s819_s15 = sshll.u32 %s1382_s7, 3 }
  0x65   : > { %854 = vmatprep.subr.mxu0 %v1119_v0  ;;  %865 = vmatprep.subr.mxu1 %v1119_v0  ;;  %s374_s18 = scalar_lea.vmem %s1356_s1, %s819_s15  ;;  %v825_v36 = vld [vmem:[%s1361_s6 + $0x1] ss:$0 sm:$0xff]  ;;  %v829_v51 = vld [vmem:[%s1361_s6] ss:$0 sm:$0xff]  ;;  %v827_v54 = vld [vmem:[%s1361_s6 + $0x2] ss:$0 sm:$0xff]  ;;  %s378_s13 = scalar_lea.vmem %s1363_s8, %s819_s15 }
  0x66   : > { %855 = vmatpush3.msra.mxu0 %v390_v3  ;;  %866 = vmatpush3.msra.mxu1 %v502_v18  ;;  %v388_v35 = vld [vmem:[%s374_s18] sm:$0xff] }
  0x67   : > { %856 = vmatprep.subr.mxu0 %v1119_v0  ;;  %867 = vmatprep.subr.mxu1 %v1119_v0  ;;  %v828_v56 = vld [vmem:[%s1361_s6 + $0x3] ss:$0 sm:$0xff]  ;;  %v831_v61 = vld [vmem:[%s1361_s6 + $0x4] ss:$0 sm:$0xff]  ;;  %v696_v1 = vstv %s695_s26 }
  0x68   : > { %857 = vmatpush3.msra.mxu0 %v389_v4  ;;  %868 = vmatpush3.msra.mxu1 %v501_v19 }
  0x69   : > { %859 = vmatmul.mubr.msk.f32.vlgmr.msra.gmra.mxu0 %vm397_vm1, %v387_v5  ;;  %880 = vmatprep.subr.mxu0 %v1119_v0 }
  0x6a   : > { %882 = vmatprep.mubr.msk.f32.mxu0 %vm1120_vm0, %v1119_v0  ;;  %869 = vmatprep.subr.mxu1 %v1119_v0 }
  0x6b   : > { %870 = vmatpush3.msra.mxu1 %v500_v20  ;;  %881 = vmatpush3.msra.mxu0 %v605_v34 }
  0x6c   : > { %871 = vmatprep.subr.mxu1 %v1119_v0 }
  0x6d   : > { %872 = vmatpush3.msra.mxu1 %v499_v21  ;;  %883 = vmatmul.mubr.msk.f32.vlgmr.msra.gmra.mxu0 %vm610_vm3, %v388_v35 }
  0x6e   : > { %873 = vmatprep.subr.mxu1 %v1119_v0 }
  0x6f   : > { %874 = vmatpush3.msra.mxu1 %v498_v22 }
  0x70   : > { %875 = vmatprep.subr.mxu1 %v1119_v0 }
  0x71   : > { %876 = vmatpush3.msra.mxu1 %v497_v23 }
 0x129   : > { %v467_v7 = vpop.f32.mrf.mxu0 }
 0x12a   : > { %v468_v8 = vadd.f32 %v821_v6, %v467_v7 }
 0x12b   : > { %v860_v9 = vpop.f32.mrf.mxu0 }
 0x12c   : > { %v472_v10 = vsel %vm471_vm2, %v468_v8, 0.0 }
 0x12d   : > { %473 = vadd.xlane.f32.xlu0 %v472_v10  ;;  %v680_v46 = vpop.f32.mrf.mxu0 }
 0x12e   : > { %v681_v52 = vadd.f32 %v829_v51, %v680_v46 }
 0x12f   : > { %v884_v47 = vpop.f32.mrf.mxu0 }
 0x130   : > { %v684_v58 = vmax.f32 %v681_v52, 0.0 }
 0x1b6   : > { %v474_v11 = vpop.xlane.xlu0 %473 }
 0x1b7   : > { %v476_v12 = vmul.f32 0.015625, %v474_v11 }
 0x1b9   : > { %v477_v13 = vsub.f32 %v468_v8, %v476_v12 }
 0x1bb   : > { %v478_v14 = vmul.f32 %v477_v13, %v477_v13 }
 0x1bd   : > { %v479_v15 = vsel %vm471_vm2, %v478_v14, 0.0 }
 0x1be   : > { %480 = vadd.xlane.f32.xlu0 %v479_v15 }
 0x247   : > { %v481_v24 = vpop.xlane.xlu0 %480 }
 0x248   : > { %v482_v25 = vmul.f32 0.015625, %v481_v24 }
 0x24a   : > { %v483_v26 = vadd.f32 1e-05, %v482_v25 }
 0x24c   : > { %959 = vrsqrt.f32 %v483_v26 }
 0x259   : > { %v960_v27 = vpop.eup %959 }
 0x25a   : > { %v485_v29 = vmul.f32 %v960_v27, %v477_v13 }
 0x25c   : > { %v490_v31 = vmul.f32 %v823_v28, %v485_v29 }
 0x25e   : > { %v495_v32 = vadd.f32 %v824_v30, %v490_v31 }
 0x260   : > { %v496_v33 = vmax.f32 %v495_v32, 0.0 }
 0x262   : > { %878 = vmatmul.mubr.msk.f32.vlgmr.msra.gmra.mxu1 %vm471_vm2, %v496_v33 }
 0x322   : > { %v578_v37 = vpop.f32.mrf.mxu1 }
 0x323   : > { %v579_v38 = vadd.f32 %v825_v36, %v578_v37 }
 0x324   : > { %v879_v39 = vpop.f32.mrf.mxu1 }
 0x325   : > { %v582_v40 = vsel %vm471_vm2, %v579_v38, 0.0 }
 0x326   : > { %583 = vadd.xlane.f32.xlu1 %v582_v40 }
 0x3af   : > { %v584_v41 = vpop.xlane.xlu1 %583 }
 0x3b0   : > { %v585_v42 = vmul.f32 0.015625, %v584_v41 }
 0x3b2   : > { %v586_v43 = vsub.f32 %v579_v38, %v585_v42 }
 0x3b4   : > { %v587_v44 = vmul.f32 %v586_v43, %v586_v43 }
 0x3b6   : > { %v588_v45 = vsel %vm471_vm2, %v587_v44, 0.0 }
 0x3b7   : > { %589 = vadd.xlane.f32.xlu1 %v588_v45 }
 0x440   : > { %v590_v48 = vpop.xlane.xlu1 %589 }
 0x441   : > { %v591_v49 = vmul.f32 0.015625, %v590_v48 }
 0x443   : > { %v592_v50 = vadd.f32 1e-05, %v591_v49 }
 0x445   : > { %961 = vrsqrt.f32 %v592_v50 }
 0x452   : > { %v962_v53 = vpop.eup %961 }
 0x453   : > { %v594_v55 = vmul.f32 %v962_v53, %v586_v43 }
 0x455   : > { %v599_v57 = vmul.f32 %v827_v54, %v594_v55 }
 0x457   : > { %v604_v59 = vadd.f32 %v828_v56, %v599_v57 }
 0x459   : > { %v685_v60 = vadd.f32 %v684_v58, %v604_v59 }
 0x45b   : > { %v686_v62 = vmax.f32 %v685_v60, 0.0 }
 0x45d   : > { %v691_v63 = vmul.f32 %v831_v61, %v686_v62 }
 0x45f   : > { %v692_v0 = vsel %vm471_vm2, %v691_v63, 0.0 }
 0x460   : > { %693 = vadd.xlane.f32.xlu0 %v692_v0 }
 0x4e9   : > { %v694_v2 = vpop.xlane.xlu0 %693 }
 0x4ea   : > { %v697_v3 = vadd.f32 %v696_v1, %v694_v2 }
 0x4ec   : > { %699 = vst.msk [vmem:[%s378_s13] sm:$0xff] %vm698_vm4, %v697_v3 }
 0x4ed PF: > { %p21_p5 = scmp.ge.s32.totalorder %s1239_s14, 5   ;;  %s1377_s29 = smov %s1103_s30 }
 0x4ee   : > { %s1378_s30 = smov %s1107_s9  ;;  %s1379_s9 = smov %s1249_s17 }
 0x4ef   : > { %s1380_s10 = smov %s1239_s14  ;;  %23 = sbr.rel (!%p21_p5) target bundleno = 7 (0x7), region = 107 }
 0x4f4   :  { %719 = vsyncpa [#allocation4], 1 }
 0x4f5   :  { %721 = vsyncpa [#allocation4 + $0x1], 1 }
 0x4f6   :  { %722 = vsyncpa [#allocation6], 1 }
 0x4f7   :  { %723 = vsyncpa [#allocation9], 1 }

</bundles_post_ra>
